<compile_context>
chip_gen: v7x
topology: tpu7x:2x2x1
jax: 0.10.0
libtpu: 0.0.40
codegen_flags: <defaults>
</compile_context>

<pallas_src>
import jax
import jax.numpy as jnp
from jax.experimental import pallas as pl
from jax.experimental.pallas import tpu as pltpu


def _affine_scale_kernel(scale_ref, x_ref, box_ref, xo_ref, bo_ref):
    n = pl.program_id(0)
    sc = scale_ref[n]                      # this image's scale factor (f32, SMEM)

    _, C, H, W = x_ref.shape
    cy = jnp.float32((H - 1) * 0.5)
    cx = jnp.float32((W - 1) * 0.5)

    # ---- column (x) interpolation matrix WxT[w_src, j_out] ------------------
    jj = jax.lax.broadcasted_iota(jnp.int32, (W, W), 1).astype(jnp.float32)
    ww = jax.lax.broadcasted_iota(jnp.int32, (W, W), 0).astype(jnp.float32)
    sx = cx + (jj - cx) / sc               # source x for every output column
    fx = jnp.floor(sx)
    ax = sx - fx
    wxt = (jnp.where(ww == fx, 1.0 - ax, 0.0)
           + jnp.where(ww == fx + 1.0, ax, 0.0))   # OOB sources drop -> zero pad

    # ---- row (y) interpolation matrix Wy[i_out, r_src] ----------------------
    ii = jax.lax.broadcasted_iota(jnp.int32, (H, H), 0).astype(jnp.float32)
    rr = jax.lax.broadcasted_iota(jnp.int32, (H, H), 1).astype(jnp.float32)
    sy = cy + (ii - cy) / sc
    fy = jnp.floor(sy)
    ay = sy - fy
    wy = (jnp.where(rr == fy, 1.0 - ay, 0.0)
          + jnp.where(rr == fy + 1.0, ay, 0.0))

    # ---- separable bilinear warp: two 2-D MXU matmuls per channel -----------
    for c in range(C):                     # C is static & small -> unrolled
        img_c = x_ref[0, c].astype(jnp.float32)                       # (H, W)
        tmp = jnp.dot(img_c, wxt, preferred_element_type=jnp.float32)  # x pass
        out_c = jnp.dot(wy, tmp, preferred_element_type=jnp.float32)   # y pass
        xo_ref[0, c] = out_c.astype(xo_ref.dtype)

    # ---- bbox_xyxy: forward affine on the coordinates -----------------------
    centers = jnp.array([[cx, cy, cx, cy]], dtype=jnp.float32)        # (1, 4)
    boxes = box_ref[0].astype(jnp.float32)                            # (B, 4)
    bo_ref[0] = (sc * (boxes - centers) + centers).astype(bo_ref.dtype)


def data_augmentation_scale(x, boxes, scales):
    """Apply per-image isotropic scale `scales[n]` to images and xyxy boxes."""
    N, C, H, W = x.shape
    B = boxes.shape[1]
    return pl.pallas_call(
        _affine_scale_kernel,
        out_shape=(jax.ShapeDtypeStruct(x.shape, x.dtype),
                   jax.ShapeDtypeStruct(boxes.shape, boxes.dtype)),
        grid_spec=pltpu.PrefetchScalarGridSpec(
            num_scalar_prefetch=1,                   # per-image scales -> SMEM
            grid=(N,),
            in_specs=[pl.BlockSpec((1, C, H, W), lambda n, s: (n, 0, 0, 0)),
                      pl.BlockSpec((1, B, 4), lambda n, s: (n, 0, 0))],
            out_specs=[pl.BlockSpec((1, C, H, W), lambda n, s: (n, 0, 0, 0)),
                       pl.BlockSpec((1, B, 4), lambda n, s: (n, 0, 0))],
        ),
        compiler_params=pltpu.CompilerParams(
            dimension_semantics=("parallel",),       # batch split across TCs
        ),
    )(scales.astype(jnp.float32), x, boxes)


def data_augmentation_scale_forward(x, boxes, *, scaling_factor, key):
    """Module-style forward: samples sc ~ U(1-s, 1+s) per image, then warps."""
    N = x.shape[0]
    scales = jax.random.uniform(key, (N,), dtype=jnp.float32,
                                minval=1.0 - scaling_factor,
                                maxval=1.0 + scaling_factor)
    return data_augmentation_scale(x, boxes, scales)


def _reference(x, boxes, scales):
    """Pure-JAX reference (same math, no Pallas) for correctness checking."""
    N, C, H, W = x.shape
    cy = (H - 1) * 0.5
    cx = (W - 1) * 0.5

    def one(img, bxs, sc):
        j = jnp.arange(W, dtype=jnp.float32)
        sx = cx + (j - cx) / sc
        fx = jnp.floor(sx); ax = sx - fx
        w = jnp.arange(W, dtype=jnp.float32)[:, None]
        wxt = (jnp.where(w == fx[None, :], 1.0 - ax[None, :], 0.0)
               + jnp.where(w == fx[None, :] + 1.0, ax[None, :], 0.0))
        i = jnp.arange(H, dtype=jnp.float32)
        sy = cy + (i - cy) / sc
        fy = jnp.floor(sy); ay = sy - fy
        r = jnp.arange(H, dtype=jnp.float32)[None, :]
        wy = (jnp.where(r == fy[:, None], 1.0 - ay[:, None], 0.0)
              + jnp.where(r == fy[:, None] + 1.0, ay[:, None], 0.0))
        img_w = jnp.einsum('ir,crw,wj->cij', wy, img.astype(jnp.float32), wxt)
        centers = jnp.array([cx, cy, cx, cy], jnp.float32)
        bxs_w = sc * (bxs - centers) + centers
        return img_w.astype(img.dtype), bxs_w.astype(bxs.dtype)

    return jax.vmap(one)(x, boxes, scales)


if __name__ == "__main__":
    key = jax.random.PRNGKey(0)
    kx, kb1, kb2, ks = jax.random.split(key, 4)

    N, C, H, W, B = 2, 4, 16, 16, 3
    x = jax.random.normal(kx, (N, C, H, W), dtype=jnp.float32)
    lo = jax.random.uniform(kb1, (N, B, 2), minval=0.0, maxval=7.0)
    hi = lo + jax.random.uniform(kb2, (N, B, 2), minval=1.0, maxval=8.0)
    y = jnp.concatenate([lo, hi], axis=-1).astype(jnp.float32)   # xyxy boxes

    scaling_factor = 0.2
    scales = jax.random.uniform(ks, (N,), dtype=jnp.float32,
                                minval=1.0 - scaling_factor,
                                maxval=1.0 + scaling_factor)

    x_aug, y_aug = data_augmentation_scale(x, y, scales)
    jax.block_until_ready((x_aug, y_aug))

    # Sanity checks against the pure-JAX reference.
    ref_x, ref_y = _reference(x, y, scales)
    assert x_aug.shape == x.shape and x_aug.dtype == x.dtype
    assert y_aug.shape == y.shape and y_aug.dtype == y.dtype
    assert bool(jnp.allclose(y_aug, ref_y, atol=1e-4, rtol=1e-4))
    assert bool(jnp.allclose(x_aug, ref_x, atol=2e-2, rtol=2e-2))

    print("KERNEL_OK")
</pallas_src>

<mosaic_0001>
module attributes {stable_mosaic.version = 11 : i64} {
  func.func @_affine_scale_kernel(%arg0: i32, %arg1: memref<2xf32, #tpu.memory_space<smem>>, %arg2: memref<1x4x16x16xf32, #tpu.memory_space<vmem>>, %arg3: memref<1x3x4xf32, #tpu.memory_space<vmem>>, %arg4: memref<1x4x16x16xf32, #tpu.memory_space<vmem>>, %arg5: memref<1x3x4xf32, #tpu.memory_space<vmem>>) attributes {dimension_semantics = [#tpu.dimension_semantics<parallel>], iteration_bounds = array<i64: 2>, scalar_prefetch = 1 : i64, scratch_operands = 0 : i64, tpu.core_type = #tpu.core_type<tc>, window_params = [{transform_indices = @transform_0, window_bounds = array<i64: 1, 4, 16, 16>}, {transform_indices = @transform_1, window_bounds = array<i64: 1, 3, 4>}, {transform_indices = @transform_2, window_bounds = array<i64: 1, 4, 16, 16>}, {transform_indices = @transform_3, window_bounds = array<i64: 1, 3, 4>}]} {
    %0 = arith.index_cast %arg0 : i32 to index
    %1 = memref.load %arg1[%0] : memref<2xf32, #tpu.memory_space<smem>>
    %2 = tpu.iota {dimensions = array<i32: 1>} : vector<16x16xi32>
    %3 = arith.sitofp %2 : vector<16x16xi32> to vector<16x16xf32>
    %4 = tpu.iota {dimensions = array<i32: 0>} : vector<16x16xi32>
    %5 = arith.sitofp %4 : vector<16x16xi32> to vector<16x16xf32>
    %cst = arith.constant 7.500000e+00 : f32
    %6 = vector.broadcast %cst : f32 to vector<16x16xf32>
    %7 = arith.subf %3, %6 : vector<16x16xf32>
    %8 = vector.broadcast %1 : f32 to vector<16x16xf32>
    %9 = arith.divf %7, %8 : vector<16x16xf32>
    %cst_0 = arith.constant 7.500000e+00 : f32
    %10 = vector.broadcast %cst_0 : f32 to vector<16x16xf32>
    %11 = arith.addf %10, %9 : vector<16x16xf32>
    %12 = math.floor %11 : vector<16x16xf32>
    %13 = arith.subf %11, %12 : vector<16x16xf32>
    %14 = arith.cmpf oeq, %5, %12 : vector<16x16xf32>
    %cst_1 = arith.constant 1.000000e+00 : f32
    %15 = vector.broadcast %cst_1 : f32 to vector<16x16xf32>
    %16 = arith.subf %15, %13 : vector<16x16xf32>
    %cst_2 = arith.constant 0.000000e+00 : f32
    %17 = vector.broadcast %cst_2 : f32 to vector<16x16xf32>
    %18 = arith.select %14, %16, %17 : vector<16x16xi1>, vector<16x16xf32>
    %cst_3 = arith.constant 1.000000e+00 : f32
    %19 = vector.broadcast %cst_3 : f32 to vector<16x16xf32>
    %20 = arith.addf %12, %19 : vector<16x16xf32>
    %21 = arith.cmpf oeq, %5, %20 : vector<16x16xf32>
    %cst_4 = arith.constant 0.000000e+00 : f32
    %22 = vector.broadcast %cst_4 : f32 to vector<16x16xf32>
    %23 = arith.select %21, %13, %22 : vector<16x16xi1>, vector<16x16xf32>
    %24 = arith.addf %18, %23 : vector<16x16xf32>
    %25 = tpu.iota {dimensions = array<i32: 0>} : vector<16x16xi32>
    %26 = arith.sitofp %25 : vector<16x16xi32> to vector<16x16xf32>
    %27 = tpu.iota {dimensions = array<i32: 1>} : vector<16x16xi32>
    %28 = arith.sitofp %27 : vector<16x16xi32> to vector<16x16xf32>
    %cst_5 = arith.constant 7.500000e+00 : f32
    %29 = vector.broadcast %cst_5 : f32 to vector<16x16xf32>
    %30 = arith.subf %26, %29 : vector<16x16xf32>
    %31 = vector.broadcast %1 : f32 to vector<16x16xf32>
    %32 = arith.divf %30, %31 : vector<16x16xf32>
    %cst_6 = arith.constant 7.500000e+00 : f32
    %33 = vector.broadcast %cst_6 : f32 to vector<16x16xf32>
    %34 = arith.addf %33, %32 : vector<16x16xf32>
    %35 = math.floor %34 : vector<16x16xf32>
    %36 = arith.subf %34, %35 : vector<16x16xf32>
    %37 = arith.cmpf oeq, %28, %35 : vector<16x16xf32>
    %cst_7 = arith.constant 1.000000e+00 : f32
    %38 = vector.broadcast %cst_7 : f32 to vector<16x16xf32>
    %39 = arith.subf %38, %36 : vector<16x16xf32>
    %cst_8 = arith.constant 0.000000e+00 : f32
    %40 = vector.broadcast %cst_8 : f32 to vector<16x16xf32>
    %41 = arith.select %37, %39, %40 : vector<16x16xi1>, vector<16x16xf32>
    %cst_9 = arith.constant 1.000000e+00 : f32
    %42 = vector.broadcast %cst_9 : f32 to vector<16x16xf32>
    %43 = arith.addf %35, %42 : vector<16x16xf32>
    %44 = arith.cmpf oeq, %28, %43 : vector<16x16xf32>
    %cst_10 = arith.constant 0.000000e+00 : f32
    %45 = vector.broadcast %cst_10 : f32 to vector<16x16xf32>
    %46 = arith.select %44, %36, %45 : vector<16x16xi1>, vector<16x16xf32>
    %47 = arith.addf %41, %46 : vector<16x16xf32>
    %c0 = arith.constant 0 : index
    %c0_11 = arith.constant 0 : index
    %c0_12 = arith.constant 0 : index
    %c0_13 = arith.constant 0 : index
    %48 = vector.load %arg2[%c0, %c0_11, %c0_12, %c0_13] : memref<1x4x16x16xf32, #tpu.memory_space<vmem>>, vector<1x1x16x16xf32>
    %49 = vector.shape_cast %48 : vector<1x1x16x16xf32> to vector<16x16xf32>
    %cst_14 = arith.constant dense<0.000000e+00> : vector<16x16xf32>
    %50 = tpu.matmul %49, %24, %cst_14 {dimension_numbers = #tpu.dot_dimension_numbers<[1], [0], [0], [1], [0, 0, 1, 1], [], []>} : vector<16x16xf32>, vector<16x16xf32>, vector<16x16xf32> -> vector<16x16xf32>
    %cst_15 = arith.constant dense<0.000000e+00> : vector<16x16xf32>
    %51 = tpu.matmul %47, %50, %cst_15 {dimension_numbers = #tpu.dot_dimension_numbers<[1], [0], [0], [1], [0, 0, 1, 1], [], []>} : vector<16x16xf32>, vector<16x16xf32>, vector<16x16xf32> -> vector<16x16xf32>
    %c0_16 = arith.constant 0 : index
    %c0_17 = arith.constant 0 : index
    %c0_18 = arith.constant 0 : index
    %c0_19 = arith.constant 0 : index
    %52 = vector.load %arg4[%c0_16, %c0_17, %c0_18, %c0_19] : memref<1x4x16x16xf32, #tpu.memory_space<vmem>>, vector<1x1x16x16xf32>
    %53 = vector.shape_cast %52 : vector<1x1x16x16xf32> to vector<16x16xf32>
    %54 = vector.shape_cast %51 : vector<16x16xf32> to vector<1x1x16x16xf32>
    tpu.vector_store %arg4[%c0_16, %c0_17, %c0_18, %c0_19], %54 {strides = array<i32>} : memref<1x4x16x16xf32, #tpu.memory_space<vmem>>, vector<1x1x16x16xf32>,
    %c0_20 = arith.constant 0 : index
    %c1 = arith.constant 1 : index
    %c0_21 = arith.constant 0 : index
    %c0_22 = arith.constant 0 : index
    %55 = vector.load %arg2[%c0_20, %c1, %c0_21, %c0_22] : memref<1x4x16x16xf32, #tpu.memory_space<vmem>>, vector<1x1x16x16xf32>
    %56 = vector.shape_cast %55 : vector<1x1x16x16xf32> to vector<16x16xf32>
    %cst_23 = arith.constant dense<0.000000e+00> : vector<16x16xf32>
    %57 = tpu.matmul %56, %24, %cst_23 {dimension_numbers = #tpu.dot_dimension_numbers<[1], [0], [0], [1], [0, 0, 1, 1], [], []>} : vector<16x16xf32>, vector<16x16xf32>, vector<16x16xf32> -> vector<16x16xf32>
    %cst_24 = arith.constant dense<0.000000e+00> : vector<16x16xf32>
    %58 = tpu.matmul %47, %57, %cst_24 {dimension_numbers = #tpu.dot_dimension_numbers<[1], [0], [0], [1], [0, 0, 1, 1], [], []>} : vector<16x16xf32>, vector<16x16xf32>, vector<16x16xf32> -> vector<16x16xf32>
    %c0_25 = arith.constant 0 : index
    %c1_26 = arith.constant 1 : index
    %c0_27 = arith.constant 0 : index
    %c0_28 = arith.constant 0 : index
    %59 = vector.load %arg4[%c0_25, %c1_26, %c0_27, %c0_28] : memref<1x4x16x16xf32, #tpu.memory_space<vmem>>, vector<1x1x16x16xf32>
    %60 = vector.shape_cast %59 : vector<1x1x16x16xf32> to vector<16x16xf32>
    %61 = vector.shape_cast %58 : vector<16x16xf32> to vector<1x1x16x16xf32>
    tpu.vector_store %arg4[%c0_25, %c1_26, %c0_27, %c0_28], %61 {strides = array<i32>} : memref<1x4x16x16xf32, #tpu.memory_space<vmem>>, vector<1x1x16x16xf32>,
    %c0_29 = arith.constant 0 : index
    %c2 = arith.constant 2 : index
    %c0_30 = arith.constant 0 : index
    %c0_31 = arith.constant 0 : index
    %62 = vector.load %arg2[%c0_29, %c2, %c0_30, %c0_31] : memref<1x4x16x16xf32, #tpu.memory_space<vmem>>, vector<1x1x16x16xf32>
    %63 = vector.shape_cast %62 : vector<1x1x16x16xf32> to vector<16x16xf32>
    %cst_32 = arith.constant dense<0.000000e+00> : vector<16x16xf32>
    %64 = tpu.matmul %63, %24, %cst_32 {dimension_numbers = #tpu.dot_dimension_numbers<[1], [0], [0], [1], [0, 0, 1, 1], [], []>} : vector<16x16xf32>, vector<16x16xf32>, vector<16x16xf32> -> vector<16x16xf32>
    %cst_33 = arith.constant dense<0.000000e+00> : vector<16x16xf32>
    %65 = tpu.matmul %47, %64, %cst_33 {dimension_numbers = #tpu.dot_dimension_numbers<[1], [0], [0], [1], [0, 0, 1, 1], [], []>} : vector<16x16xf32>, vector<16x16xf32>, vector<16x16xf32> -> vector<16x16xf32>
    %c0_34 = arith.constant 0 : index
    %c2_35 = arith.constant 2 : index
    %c0_36 = arith.constant 0 : index
    %c0_37 = arith.constant 0 : index
    %66 = vector.load %arg4[%c0_34, %c2_35, %c0_36, %c0_37] : memref<1x4x16x16xf32, #tpu.memory_space<vmem>>, vector<1x1x16x16xf32>
    %67 = vector.shape_cast %66 : vector<1x1x16x16xf32> to vector<16x16xf32>
    %68 = vector.shape_cast %65 : vector<16x16xf32> to vector<1x1x16x16xf32>
    tpu.vector_store %arg4[%c0_34, %c2_35, %c0_36, %c0_37], %68 {strides = array<i32>} : memref<1x4x16x16xf32, #tpu.memory_space<vmem>>, vector<1x1x16x16xf32>,
    %c0_38 = arith.constant 0 : index
    %c3 = arith.constant 3 : index
    %c0_39 = arith.constant 0 : index
    %c0_40 = arith.constant 0 : index
    %69 = vector.load %arg2[%c0_38, %c3, %c0_39, %c0_40] : memref<1x4x16x16xf32, #tpu.memory_space<vmem>>, vector<1x1x16x16xf32>
    %70 = vector.shape_cast %69 : vector<1x1x16x16xf32> to vector<16x16xf32>
    %cst_41 = arith.constant dense<0.000000e+00> : vector<16x16xf32>
    %71 = tpu.matmul %70, %24, %cst_41 {dimension_numbers = #tpu.dot_dimension_numbers<[1], [0], [0], [1], [0, 0, 1, 1], [], []>} : vector<16x16xf32>, vector<16x16xf32>, vector<16x16xf32> -> vector<16x16xf32>
    %cst_42 = arith.constant dense<0.000000e+00> : vector<16x16xf32>
    %72 = tpu.matmul %47, %71, %cst_42 {dimension_numbers = #tpu.dot_dimension_numbers<[1], [0], [0], [1], [0, 0, 1, 1], [], []>} : vector<16x16xf32>, vector<16x16xf32>, vector<16x16xf32> -> vector<16x16xf32>
    %c0_43 = arith.constant 0 : index
    %c3_44 = arith.constant 3 : index
    %c0_45 = arith.constant 0 : index
    %c0_46 = arith.constant 0 : index
    %73 = vector.load %arg4[%c0_43, %c3_44, %c0_45, %c0_46] : memref<1x4x16x16xf32, #tpu.memory_space<vmem>>, vector<1x1x16x16xf32>
    %74 = vector.shape_cast %73 : vector<1x1x16x16xf32> to vector<16x16xf32>
    %75 = vector.shape_cast %72 : vector<16x16xf32> to vector<1x1x16x16xf32>
    tpu.vector_store %arg4[%c0_43, %c3_44, %c0_45, %c0_46], %75 {strides = array<i32>} : memref<1x4x16x16xf32, #tpu.memory_space<vmem>>, vector<1x1x16x16xf32>,
    %cst_47 = arith.constant 7.500000e+00 : f32
    %76 = vector.broadcast %cst_47 : f32 to vector<1xf32>
    %cst_48 = arith.constant 7.500000e+00 : f32
    %77 = vector.broadcast %cst_48 : f32 to vector<1xf32>
    %cst_49 = arith.constant 7.500000e+00 : f32
    %78 = vector.broadcast %cst_49 : f32 to vector<1xf32>
    %cst_50 = arith.constant 7.500000e+00 : f32
    %79 = vector.broadcast %cst_50 : f32 to vector<1xf32>
    %80 = tpu.concatenate %76, %77, %78, %79 in 0 : vector<1xf32>, vector<1xf32>, vector<1xf32>, vector<1xf32> -> vector<4xf32>
    %81 = vector.shape_cast %80 : vector<4xf32> to vector<1x4xf32>
    %c0_51 = arith.constant 0 : index
    %c0_52 = arith.constant 0 : index
    %c0_53 = arith.constant 0 : index
    %82 = vector.load %arg3[%c0_51, %c0_52, %c0_53] : memref<1x3x4xf32, #tpu.memory_space<vmem>>, vector<1x3x4xf32>
    %83 = vector.shape_cast %82 : vector<1x3x4xf32> to vector<3x4xf32>
    %84 = vector.broadcast %81 : vector<1x4xf32> to vector<3x4xf32>
    %85 = arith.subf %83, %84 : vector<3x4xf32>
    %86 = vector.broadcast %1 : f32 to vector<3x4xf32>
    %87 = arith.mulf %86, %85 : vector<3x4xf32>
    %88 = vector.broadcast %81 : vector<1x4xf32> to vector<3x4xf32>
    %89 = arith.addf %87, %88 : vector<3x4xf32>
    %c0_54 = arith.constant 0 : index
    %c0_55 = arith.constant 0 : index
    %c0_56 = arith.constant 0 : index
    %90 = vector.load %arg5[%c0_54, %c0_55, %c0_56] : memref<1x3x4xf32, #tpu.memory_space<vmem>>, vector<1x3x4xf32>
    %91 = vector.shape_cast %90 : vector<1x3x4xf32> to vector<3x4xf32>
    %92 = vector.shape_cast %89 : vector<3x4xf32> to vector<1x3x4xf32>
    tpu.vector_store %arg5[%c0_54, %c0_55, %c0_56], %92 {strides = array<i32>} : memref<1x3x4xf32, #tpu.memory_space<vmem>>, vector<1x3x4xf32>,
    return
  }
  func.func @transform_0(%arg0: i32, %arg1: memref<2xf32, #tpu.memory_space<smem>>) -> (i32, i32, i32, i32) {
    %c0_i32 = arith.constant 0 : i32
    %c0_i32_0 = arith.constant 0 : i32
    %c0_i32_1 = arith.constant 0 : i32
    %c0_i32_2 = arith.constant 0 : i32
    return %arg0, %c0_i32, %c0_i32_0, %c0_i32_1 : i32, i32, i32, i32
  }
  func.func @transform_1(%arg0: i32, %arg1: memref<2xf32, #tpu.memory_space<smem>>) -> (i32, i32, i32) {
    %c0_i32 = arith.constant 0 : i32
    %c0_i32_0 = arith.constant 0 : i32
    %c0_i32_1 = arith.constant 0 : i32
    return %arg0, %c0_i32, %c0_i32_0 : i32, i32, i32
  }
  func.func @transform_2(%arg0: i32, %arg1: memref<2xf32, #tpu.memory_space<smem>>) -> (i32, i32, i32, i32) {
    %c0_i32 = arith.constant 0 : i32
    %c0_i32_0 = arith.constant 0 : i32
    %c0_i32_1 = arith.constant 0 : i32
    %c0_i32_2 = arith.constant 0 : i32
    return %arg0, %c0_i32, %c0_i32_0, %c0_i32_1 : i32, i32, i32, i32
  }
  func.func @transform_3(%arg0: i32, %arg1: memref<2xf32, #tpu.memory_space<smem>>) -> (i32, i32, i32) {
    %c0_i32 = arith.constant 0 : i32
    %c0_i32_0 = arith.constant 0 : i32
    %c0_i32_1 = arith.constant 0 : i32
    return %arg0, %c0_i32, %c0_i32_0 : i32, i32, i32
  }
}

</mosaic_0001>

<bundles_post_ra>
// kernel: tpu_custom_call.1
= control target key start
LH: loop header
LB: loop body
LE: loop exit
PB: predicated region body
PF: predicated region fallthrough
CT: control target
= control target key end

     0   :  { %s1658_s0 = inlined_call_operand.vmem [shape: f32[2], index: 0, kind: input, shape index: {}]   ;;  %s1659_s1 = inlined_call_operand.hbm [shape: f32[2,4,16,16], index: 1, kind: input, shape index: {}]   ;;  %s1660_s2 = inlined_call_operand.vmem [shape: f32[2,3,4], index: 2, kind: input, shape index: {}]   ;;  %s1661_s3 = inlined_call_operand.hbm [shape: f32[2,4,16,16], index: 3, kind: output, shape index: {0}]   ;;  %s1662_s4 = inlined_call_operand.vmem [shape: f32[2,3,4], index: 4, kind: output, shape index: {1}]  }
   0x1   :  { %s10_s17 = sshll.u32 %s1658_s0, 4  ;;  %s11_s17 = int_to_ptr.vmem [resolvable:$true] %s10_s17 }
   0x2   :  { %s1294_s18 = scalar_lea.vmem %s11_s17, 16  ;;  %p1299_p1 = scmp.lt.s32.totalorder %s11_s17, %s11_s17 }
   0x3   :  { %p1295_p0 = scmp.ne.s32.totalorder %s11_s17, %s1294_s18  ;;  %p1300_p2 = scmp.lt.s32.totalorder %s1294_s18, %s1294_s18 }
   0x5   :  { %p1301_p3 = por %p1300_p2, %p1299_p1 }
   0x7   :  { %p1302_p4 = pnand %p1301_p3, %p1295_p0 }
   0x9   :  { %1305 = shalt.err (!%p1302_p4)  }
   0xa   :  { %s1406_s19 = smov [#allocation3]  }
   0xb   :  { %13 = dma.vmem_to_smem %s11_s17, 16, %s1406_s19, [#allocation2] }
   0xc   :  { %1380 = dma.done.wait [#allocation2], 16 }
   0xd   :  { %1381 = vsyncadd [#allocation2], 4294967280 }
   0xe   :  { %15 = sfence }
   0xf   :  { %16 = vsyncpa [#allocation5], 0 }
  0x10   :  { %18 = vsyncpa [#allocation5 + $0x1], 0 }
  0x11   :  { %19 = vsyncpa [#allocation6], 0 }
  0x12   :  { %21 = vsyncpa [#allocation6 + $0x1], 0  ;;  %s1442_s20 = smov 0   ;;  %s1444_s0 = smov 0  }
  0x13   :  { %s1446_s21 = smov 0   ;;  %s1448_s22 = smov 0  }
  0x14 LB: > { %s1463_s23 = sadd.s32 4294967295, %s1404_s22   ;;  %s1071_s24 = sadd.s32 4294967294, %s1404_s22   ;;  %s1404_s22 = sphi %s1448_s22, %s1675_s22   ;;  %s1400_s21 = sphi %s1446_s21, %s1674_s21   ;;  %s1396_s0 = sphi %s1444_s0, %s1673_s0   ;;  %s1392_s20 = sphi %s1442_s20, %s1672_s20  }
  0x15   : > { %s1467_s25 = sadd.s32 1, %s1404_s22   ;;  %s34_s26 = sadd.s32 1, %s1400_s21 }
  0x16   : > { %s31_s27 = ssub.s32 %s1404_s22, %s1467_s25  ;;  %p41_p5 = scmp.ne.s32.totalorder %s1400_s21, %s1396_s0 }
  0x17   : > { %p32_p6 = scmp.eq.s32.totalorder %s31_s27, 0  ;;  %p42_p7 = scmp.eq.s32.totalorder %s1404_s22, 0 }
  0x18   : > { %p47_p8 = scmp.ne.s32.totalorder %s1396_s0, %s1392_s20  ;;  %p48_p9 = scmp.eq.s32.totalorder %s1463_s23, 0 }
  0x19   : > { %s1479_s28 = scalar_select %p32_p6, %s1400_s21, %s34_s26  }
  0x1a   : > { %p1481_p10 = por %p42_p7, %p41_p5  ;;  %p1485_p11 = por %p48_p9, %p47_p8 }
  0x1b   : > { %p97_p12 = scmp.eq.s32.totalorder %s1463_s23, 1  ;;  %p103_p13 = scmp.eq.s32.totalorder %s1071_s24, 1 }
  0x1c   : > { %p1252_p1 = scmp.lt.s32.totalorder %s1404_s22, 2  ;;  %s149_s7 = sand.u32 1, %s1400_s21  }
  0x1d   : > { %p1492_p2 = por %p97_p12, %p41_p5  ;;  %p1496_p3 = por %p103_p13, %p47_p8 }
  0x1e   : > { %s1118_s8 = sshll.u32 %s1404_s22, 10  ;;  %s1074_s9 = sshll.u32 %s149_s7, 6 }
  0x1f   : > { %s1666_s5 = scalar_select %p1492_p2, 1, 0 }
  0x20   : > { %s1667_s6 = scalar_select %p1496_p3, 1, 0 }
  0x21   : > { %s1505_s12 = scalar_lea.hbm %s1659_s1, %s1118_s8  ;;  %s153_s13 = scalar_lea.vmem [#allocation4], %s1074_s9 }
  0x22   : > { %s160_s14 = sshll.u32 %s153_s13, 4  ;;  %p1509_p4 = pnand %p1252_p1, %p1481_p10  ;;  %s1513_s14 = int_to_ptr.vmem [resolvable:$true] %s160_s14 }
  0x23   : > { %s1515_s16 = scalar_lea.sflag [#allocation5], %s149_s7  ;;  %s1306_s17 = scalar_lea.hbm %s1505_s12, 1024 }
  0x24   : > { %p1307_p5 = scmp.ne.s32.totalorder %s1505_s12, %s1306_s17  ;;  %p1308_p6 = pneg %p1509_p4 }
  0x25   : > { %s1311_s24 = scalar_lea.hbm %s1659_s1, 2048  ;;  %p1312_p9 = scmp.lt.u32.totalorder %s1505_s12, %s1659_s1 }
  0x26   : > { %p1309_p7 = pnand %p1308_p6, %p1307_p5  ;;  %p1313_p10 = scmp.lt.u32.totalorder %s1311_s24, %s1306_s17 }
  0x27   : > { %p1315_p13 = scmp.lt.u32.totalorder %s1306_s17, %s1505_s12 }
  0x28   : > { %p1310_p8 = pneg %p1309_p7  ;;  %p1314_p12 = por %p1313_p10, %p1312_p9 }
  0x2a   : > { %p1316_p1 = por %p1315_p13, %p1314_p12 }
  0x2c   : > { %p1317_p0 = pnand %p1316_p1, %p1310_p8 }
  0x2e   : > { %1320 = shalt.err (!%p1317_p0)
}
  0x2f   : > { %s1321_s29 = scalar_lea.vmem %s1513_s14, 1024  ;;  %s1407_s7 = smov [#allocation4]  }
  0x30   : > { %p1322_p5 = scmp.ne.s32.totalorder %s1513_s14, %s1321_s29  ;;  %s1326_s8 = sshll.u32 %s1407_s7, 4  ;;  %s1327_s8 = int_to_ptr.vmem [resolvable:$false] %s1326_s8 }
  0x31   : > { %s1328_s9 = scalar_lea.vmem %s1327_s8, 2048  ;;  %p1329_p2 = scmp.lt.s32.totalorder %s1513_s14, %s1327_s8 }
  0x32   : > { %p1324_p7 = pnand %p1322_p5, %p1308_p6  ;;  %p1330_p9 = scmp.lt.s32.totalorder %s1328_s9, %s1321_s29 }
  0x34   : > { %p1325_p3 = pneg %p1324_p7  ;;  %p1331_p10 = por %p1330_p9, %p1329_p2 }
  0x36   : > { %p1332_p12 = pnand %p1331_p10, %p1325_p3 }
  0x38   : > { %1335 = shalt.err (!%p1332_p12)
}
  0x39   : > { %s1408_s10 = smov 128   ;;  %s1409_s11 = smov 8  }
  0x3a   : > { %1247 = dma.hbm_to_vmem [thread:$0]  (!%p1509_p4), %s1505_s12, 1024, %s1513_s14, %s1515_s16, %s1408_s10, %s1408_s10, %s1409_s11  }
  0x3b   : > { %p1077_p0 = scmp.ge.s32.totalorder %s1404_s22, 1  ;;  %p175_p6 = scmp.lt.s32.totalorder %s1404_s22, 3 }
  0x3d   : > { %p176_p8 = pnand %p1077_p0, %p175_p6 }
  0x3e   : > { %s1546_s13 = sand.u32 (!%p176_p8), 1, %s1396_s0  }
  0x3f   : > { %179 = sbr.rel (%p176_p8) target bundleno = 567 (0x237), region = 28  ;;  %s1078_s17 = sshll.u32 (!%p176_p8), %s1546_s13, 6 }
  0x40   : > { %s182_s18 = scalar_lea.sflag (!%p176_p8), [#allocation5], %s1546_s13  ;;  %s1552_s19 = scalar_lea.vmem (!%p176_p8), [#allocation4], %s1078_s17 }
  0x46   : > { %1383 = dma.done.wait (%p1485_p11), %s182_s18, 1024  }
  0x47   : > { %1385 = vsyncadd (%p1485_p11), %s182_s18, 4294966272  ;;  %p216_p2 = scmp.lt.s32.totalorder %s1463_s23, 1  ;;  %v225_v0 = vlaneseq  ;;  %s224_s12 = sld [smem:[#allocation3 + %s1463_s23]]  ;;  %vm278_vm0 = vcmask 130048   ;;  %v1410_v3 = vmov 7.5   ;;  %v276_v8 = vld [vmem:[%s1552_s19] sm:$0xff] }
  0x48   : > { %1156 = vmatprep.mubr.msk.f32.mxu0 %vm278_vm0, %v276_v8  ;;  %vm939_vm1 = vcmask 26624   ;;  %v277_v31 = vld [vmem:[%s1552_s19 + $0x8] sm:$0xff]  ;;  %v1089_v32 = vld [vmem:[%s1552_s19 + $0x10] sm:$0xff]  ;;  %v1090_v33 = vld [vmem:[%s1552_s19 + $0x18] sm:$0xff]  ;;  %s209_s7 = scalar_lea.vmem [#allocation7], %s1078_s17  ;;  %s1119_s9 = sshll.u32 %s1463_s23, 10 }
  0x49   : > { %s217_s14 = scalar_select %p216_p2, %s1463_s23, 1  ;;  %v229_v1 = vshrl.u32 %v225_v0, 7  ;;  %v226_v5 = vand.u32 127, %v225_v0  ;;  %v1097_v34 = vld [vmem:[%s1552_s19 + $0x20] sm:$0xff]  ;;  %v1098_v35 = vld [vmem:[%s1552_s19 + $0x28] sm:$0xff]  ;;  %v1105_v36 = vld [vmem:[%s1552_s19 + $0x30] sm:$0xff] }
  0x4a   : > { %v1106_v37 = vld [vmem:[%s1552_s19 + $0x38] sm:$0xff]  ;;  %s959_s8 = sshll.u32 %s209_s7, 4  ;;  %s1612_s17 = scalar_lea.hbm %s1661_s3, %s1119_s9  ;;  %s1606_s8 = int_to_ptr.vmem [resolvable:$true] %s959_s8 }
  0x4b   : > { %s1080_s15 = sshll.u32 %s217_s14, 2  ;;  %v933_v2 = vsub.s32 0, %v229_v1  ;;  %v1569_v11 = vcvt.s32.f32 %v226_v5  ;;  %v230_v15 = vadd.s32 8, %v229_v1  ;;  %v231_v18 = vcvt.s32.f32 %v229_v1  ;;  %s942_s23 = scalar_lea.sflag [#allocation6], %s1546_s13 }
  0x4c   : > { %s219_s26 = scalar_lea.vmem %s1660_s2, %s1080_s15  ;;  %s223_s29 = scalar_lea.vmem %s1662_s4, %s1080_s15 }
  0x4d   : > { %v934_v4 = vrot.slane %v1410_v3, %v933_v2  ;;  %v234_v6 = vstv %s224_s12  ;;  %v929_v7 = vld [vmem:[%s219_s26] sm:$0x7]  ;;  %v1082_v13 = vadd.f32 -7.5, %v1569_v11  ;;  %v232_v19 = vcvt.s32.f32 %v230_v15  ;;  %s1336_s18 = scalar_lea.vmem %s1606_s8, 1024  ;;  %p1669_p3 = scmp.ne.s32.totalorder %s1666_s5, 0 }
  0x4e   : > { %1292 = vrcp.f32 %v234_v6  ;;  %v1083_v38 = vadd.f32 -7.5, %v231_v18  ;;  %p1337_p11 = scmp.ne.s32.totalorder %s1606_s8, %s1336_s18  ;;  %s1411_s19 = smov [#allocation7]  }
  0x4f   : > { %v936_v9 = vsub.f32 %v929_v7, %v934_v4  ;;  %v1084_v48 = vadd.f32 -7.5, %v232_v19  ;;  %s1340_s12 = sshll.u32 %s1411_s19, 4  ;;  %s1341_s12 = int_to_ptr.vmem [resolvable:$false] %s1340_s12 }
  0x50   : > { %p1338_p4 = pnand %p1337_p11, %p1669_p3  ;;  %s1342_s14 = scalar_lea.vmem %s1341_s12, 2048 }
  0x51   : > { %v937_v10 = vmul.f32 %v936_v9, %v234_v6  ;;  %p1343_p1 = scmp.lt.s32.totalorder %s1606_s8, %s1341_s12  ;;  %p1344_p5 = scmp.lt.s32.totalorder %s1342_s14, %s1336_s18 }
  0x52   : > { %p1339_p13 = pneg %p1338_p4 }
  0x53   : > { %v938_v12 = vadd.f32 %v937_v10, %v934_v4  ;;  %p1345_p7 = por %p1344_p5, %p1343_p1 }
  0x55   : > { %940 = vst.msk [vmem:[%s223_s29] sm:$0x7] %vm939_vm1, %v938_v12  ;;  %p1346_p9 = pnand %p1345_p7, %p1339_p13 }
  0x58   : > { %v1293_v14 = vpop.eup %1292 }
  0x59   : > { %v236_v16 = vmul.f32 %v1293_v14, %v1082_v13  ;;  %v254_v39 = vmul.f32 %v1293_v14, %v1083_v38  ;;  %v255_v49 = vmul.f32 %v1293_v14, %v1084_v48 }
  0x5b   : > { %v237_v17 = vadd.f32 7.5, %v236_v16  ;;  %v256_v40 = vadd.f32 7.5, %v254_v39  ;;  %v257_v50 = vadd.f32 7.5, %v255_v49 }
  0x5d   : > { %v238_v20 = vfloor.f32 %v237_v17  ;;  %v258_v41 = vfloor.f32 %v256_v40  ;;  %v259_v51 = vfloor.f32 %v257_v50 }
  0x5f   : > { %v239_v21 = vsub.f32 %v237_v17, %v238_v20  ;;  %v245_v22 = vadd.f32 1.0, %v238_v20  ;;  %vm240_vm2 = vcmp.eq.f32.partialorder %v231_v18, %v238_v20  ;;  %vm241_vm3 = vcmp.eq.f32.partialorder %v232_v19, %v238_v20 }
  0x60   : > { %v260_v42 = vsub.f32 %v256_v40, %v258_v41  ;;  %v268_v43 = vadd.f32 1.0, %v258_v41  ;;  %vm262_vm6 = vcmp.eq.f32.partialorder %v1569_v11, %v258_v41  ;;  %v261_v52 = vsub.f32 %v257_v50, %v259_v51 }
  0x61   : > { %v242_v23 = vsub.f32 1.0, %v239_v21  ;;  %vm246_vm4 = vcmp.eq.f32.partialorder %v231_v18, %v245_v22  ;;  %vm247_vm5 = vcmp.eq.f32.partialorder %v232_v19, %v245_v22  ;;  %v269_v53 = vadd.f32 1.0, %v259_v51 }
  0x62   : > { %v248_v24 = vsel %vm246_vm4, %v239_v21, 0.0  ;;  %v249_v25 = vsel %vm247_vm5, %v239_v21, 0.0  ;;  %v264_v44 = vsub.f32 1.0, %v260_v42  ;;  %vm270_vm7 = vcmp.eq.f32.partialorder %v1569_v11, %v268_v43 }
  0x63   : > { %v243_v26 = vsel %vm240_vm2, %v242_v23, 0.0  ;;  %v244_v27 = vsel %vm241_vm3, %v242_v23, 0.0  ;;  %v272_v46 = vsel %vm270_vm7, %v260_v42, 0.0  ;;  %v265_v54 = vsub.f32 1.0, %v261_v52 }
  0x64   : > { %v250_v28 = vadd.f32 %v248_v24, %v243_v26  ;;  %v251_v29 = vadd.f32 %v249_v25, %v244_v27  ;;  %v266_v45 = vsel %vm262_vm6, %v264_v44, 0.0  ;;  %vm263_vm8 = vcmp.eq.f32.partialorder %v1569_v11, %v259_v51 }
  0x65   : > { %v274_v47 = vadd.f32 %v272_v46, %v266_v45  ;;  %vm271_vm9 = vcmp.eq.f32.partialorder %v1569_v11, %v269_v53  ;;  %v267_v57 = vsel %vm263_vm8, %v265_v54, 0.0 }
  0x66   : > { %v1208_v30 = vpack.c.bf16 %v251_v29, %v250_v28  ;;  %v273_v58 = vsel %vm271_vm9, %v261_v52, 0.0 }
  0x67   : > { %1163 = vmatprep.mubr.msk.f32.mxu1 %vm278_vm0, %v274_v47  ;;  %v275_v61 = vadd.f32 %v273_v58, %v267_v57 }
  0x68   : > { %1209 = vmatprep.subr.bf16.mxu0 %v1208_v30 }
  0x69   : > { %1211 = vmatpush3.bf16.msra.mxu0 %v1208_v30 }
  0x6a   : > { %1217 = vmatprep.subr.bf16.mxu0 %v1208_v30 }
  0x6c   : > { %1157 = vmatmul.mubr.msk.f32.vlgmr.msra.gmra.mrb[0].mxu0 %vm278_vm0, %v277_v31 }
  0x6d   : > { %1219 = vmatpush3.bf16.msra.mxu0 %v1208_v30  ;;  %1170 = vmatprep.mubr.msk.f32.mxu0 %vm278_vm0, %v1089_v32 }
  0x6e   : > { %1225 = vmatprep.subr.bf16.mxu0 %v1208_v30 }
  0x70   : > { %1171 = vmatmul.mubr.msk.f32.vlgmr.msra.gmra.mrb[2].mxu0 %vm278_vm0, %v1090_v33 }
  0x71   : > { %1227 = vmatpush3.bf16.msra.mxu0 %v1208_v30  ;;  %1184 = vmatprep.mubr.msk.f32.mxu0 %vm278_vm0, %v1097_v34 }
  0x72   : > { %1233 = vmatprep.subr.bf16.mxu0 %v1208_v30 }
  0x74   : > { %1185 = vmatmul.mubr.msk.f32.vlgmr.msra.gmra.mrb[4].mxu0 %vm278_vm0, %v1098_v35 }
  0x75   : > { %1235 = vmatpush3.bf16.msra.mxu0 %v1208_v30  ;;  %1198 = vmatprep.mubr.msk.f32.mxu0 %vm278_vm0, %v1105_v36 }
  0x78   : > { %1199 = vmatmul.mubr.msk.f32.vlgmr.msra.gmra.mrb[6].mxu0 %vm278_vm0, %v1106_v37 }
 0x13f   : > { %v1158_v55 = vpop.f32.mrb[0].mxu0 }
 0x140   : > { %v351_v56 = vpop.f32.mrb[1].mxu0 }
 0x141   : > { %v1212_v59 = vpack.c.bf16 %v1158_v55, %v351_v56 }
 0x143   : > { %1213 = vmatprep.subr.bf16.mxu1 %v1212_v59  ;;  %v1172_v60 = vpop.f32.mrb[2].mxu0 }
 0x144   : > { %1215 = vmatpush3.bf16.msra.mxu1 %v1212_v59  ;;  %v518_v62 = vpop.f32.mrb[3].mxu0 }
 0x145   : > { %v1220_v63 = vpack.c.bf16 %v1172_v60, %v518_v62 }
 0x147   : > { %1164 = vmatmul.mubr.msk.f32.vlgmr.msra.gmra.mrb[0].mxu1 %vm278_vm0, %v275_v61  ;;  %1221 = vmatprep.subr.bf16.mxu1 %v1220_v63  ;;  %v1186_v0 = vpop.f32.mrb[4].mxu0 }
 0x148   : > { %1223 = vmatpush3.bf16.msra.mxu1 %v1220_v63  ;;  %v680_v1 = vpop.f32.mrb[5].mxu0  ;;  %1177 = vmatprep.mubr.msk.f32.mxu1 %vm278_vm0, %v274_v47 }
 0x149   : > { %v1228_v2 = vpack.c.bf16 %v1186_v0, %v680_v1 }
 0x14b   : > { %1178 = vmatmul.mubr.msk.f32.vlgmr.msra.gmra.mrb[2].mxu1 %vm278_vm0, %v275_v61  ;;  %1229 = vmatprep.subr.bf16.mxu1 %v1228_v2  ;;  %v1200_v3 = vpop.f32.mrb[6].mxu0 }
 0x14c   : > { %1231 = vmatpush3.bf16.msra.mxu1 %v1228_v2  ;;  %v842_v4 = vpop.f32.mrb[7].mxu0  ;;  %1191 = vmatprep.mubr.msk.f32.mxu1 %vm278_vm0, %v274_v47 }
 0x14d   : > { %v1236_v5 = vpack.c.bf16 %v1200_v3, %v842_v4 }
 0x14f   : > { %1192 = vmatmul.mubr.msk.f32.vlgmr.msra.gmra.mrb[4].mxu1 %vm278_vm0, %v275_v61  ;;  %1237 = vmatprep.subr.bf16.mxu1 %v1236_v5 }
 0x150   : > { %1239 = vmatpush3.bf16.msra.mxu1 %v1236_v5  ;;  %1205 = vmatprep.mubr.msk.f32.mxu1 %vm278_vm0, %v274_v47 }
 0x153   : > { %1206 = vmatmul.mubr.msk.f32.vlgmr.msra.gmra.mrb[6].mxu1 %vm278_vm0, %v275_v61 }
 0x21a   : > { %v1165_v6 = vpop.f32.mrb[0].mxu1 }
 0x21b   : > { %442 = vst.msk [vmem:[%s209_s7 + $0x8] sm:$0xff] %vm278_vm0, %v1165_v6  ;;  %v432_v7 = vpop.f32.mrb[1].mxu1 }
 0x21c   : > { %441 = vst.msk [vmem:[%s209_s7] sm:$0xff] %vm278_vm0, %v432_v7 }
 0x21e   : > { %v1179_v8 = vpop.f32.mrb[2].mxu1 }
 0x21f   : > { %1096 = vst.msk [vmem:[%s209_s7 + $0x18] sm:$0xff] %vm278_vm0, %v1179_v8  ;;  %v593_v9 = vpop.f32.mrb[3].mxu1 }
 0x220   : > { %1095 = vst.msk [vmem:[%s209_s7 + $0x10] sm:$0xff] %vm278_vm0, %v593_v9 }
 0x222   : > { %v1193_v10 = vpop.f32.mrb[4].mxu1 }
 0x223   : > { %1104 = vst.msk [vmem:[%s209_s7 + $0x28] sm:$0xff] %vm278_vm0, %v1193_v10  ;;  %v755_v11 = vpop.f32.mrb[5].mxu1 }
 0x224   : > { %1103 = vst.msk [vmem:[%s209_s7 + $0x20] sm:$0xff] %vm278_vm0, %v755_v11 }
 0x226   : > { %v1207_v12 = vpop.f32.mrb[6].mxu1 }
 0x227   : > { %1112 = vst.msk [vmem:[%s209_s7 + $0x38] sm:$0xff] %vm278_vm0, %v1207_v12  ;;  %v917_v13 = vpop.f32.mrb[7].mxu1 }
 0x228   : > { %1111 = vst.msk [vmem:[%s209_s7 + $0x30] sm:$0xff] %vm278_vm0, %v917_v13 }
 0x229   : > { %1349 = shalt.err (!%p1346_p9)
}
 0x22a   : > { %s1350_s15 = scalar_lea.hbm %s1612_s17, 1024  ;;  %s1354_s26 = scalar_lea.hbm %s1661_s3, 2048 }
 0x22b   : > { %p1351_p10 = scmp.ne.s32.totalorder %s1612_s17, %s1350_s15  ;;  %p1355_p6 = scmp.lt.u32.totalorder %s1612_s17, %s1661_s3 }
 0x22c   : > { %p1356_p8 = scmp.lt.u32.totalorder %s1354_s26, %s1350_s15  ;;  %p1358_p11 = scmp.lt.u32.totalorder %s1350_s15, %s1612_s17 }
 0x22d   : > { %p1352_p12 = pnand %p1351_p10, %p1669_p3 }
 0x22e   : > { %p1357_p2 = por %p1356_p8, %p1355_p6 }
 0x22f   : > { %p1353_p0 = pneg %p1352_p12 }
 0x230   : > { %p1359_p4 = por %p1358_p11, %p1357_p2 }
 0x232   : > { %p1360_p13 = pnand %p1359_p4, %p1353_p0 }
 0x234   : > { %1363 = shalt.err (!%p1360_p13)
}
 0x235   : > { %s1412_s29 = smov 128   ;;  %s1413_s7 = smov 8  }
 0x236   : > { %1242 = dma.vmem_to_hbm [thread:$0]  (%p1669_p3), %s1606_s8, 1024, %s1612_s17, %s942_s23, %s1412_s29, %s1412_s29, %s1413_s7  }
 0x237 PF: > { %s977_s9 = sand.u32 1, %s1392_s20   ;;  %p1670_p1 = scmp.ne.s32.totalorder %s1667_s6, 0 }
 0x238   : > { %p1671_p5 = scmp.ge.s32.totalorder %s1404_s22, 2  ;;  %s978_s10 = scalar_lea.sflag [#allocation6], %s977_s9 }
 0x23a   : > { %p1249_p7 = pnand %p1671_p5, %p1670_p1 }
 0x23c   : > { %1387 = dma.done.wait (!%p1249_p7), %s978_s10, 1024  }
 0x23d   : > { %1389 = vsyncadd (!%p1249_p7), %s978_s10, 4294966272  ;;  %p24_p9 = scmp.ge.s32.totalorder %s1467_s25, 4   ;;  %s1672_s20 = smov %s1396_s0 }
 0x23e   : > { %s1673_s0 = smov %s1400_s21  ;;  %s1674_s21 = smov %s1479_s28 }
 0x23f   : > { %s1675_s22 = smov %s1467_s25  ;;  %26 = sbr.rel (!%p24_p9) target bundleno = 20 (0x14), region = 94 }
 0x246   :  { %990 = vsyncpa [#allocation5], 1 }
 0x247   :  { %992 = vsyncpa [#allocation5 + $0x1], 1 }
 0x248   :  { %993 = vsyncpa [#allocation6], 1 }
 0x249   :  { %995 = vsyncpa [#allocation6 + $0x1], 1 }

</bundles_post_ra>
